<compile_context>
chip_gen: v6e
topology: v6e:2x2x1
jax: 0.10.0
libtpu: 0.0.40
codegen_flags: <defaults>
</compile_context>

<pallas_src>
import functools

import jax
import jax.numpy as jnp
from jax.experimental import pallas as pl
from jax.experimental.pallas import tpu as pltpu


def _round_up(x, m):
    return (x + m - 1) // m * m


def _resident_spec(arr):
    """Whole-array VMEM-resident block (constant index_map => fetched once)."""
    return pl.BlockSpec(arr.shape, lambda i: (0, 0))


def _ncf_kernel(num_layers, *refs):
    # refs = (eu_gmf, ei_gmf, eu_mlp, ei_mlp,
    #         W0_user, W0_item, b0,
    #         W_1, b_1, ..., W_{L-1}, b_{L-1},
    #         w_pred_gmf, w_pred_mlp, b_pred, out_ref)
    eu_gmf, ei_gmf, eu_mlp, ei_mlp, w0u, w0i, b0 = refs[:7]
    n_rest = 2 * (num_layers - 1)
    layer_refs = refs[7:7 + n_rest]
    w_gmf, w_mlp, b_pred, out_ref = refs[7 + n_rest:7 + n_rest + 4]

    # --- GMF branch: elementwise product (VPU), accumulate in f32 ---------
    og = eu_gmf[...].astype(jnp.float32) * ei_gmf[...].astype(jnp.float32)

    # --- MLP branch: first layer without concat (split W0) ---------------
    x = (jnp.dot(eu_mlp[...], w0u[...], preferred_element_type=jnp.float32)
         + jnp.dot(ei_mlp[...], w0i[...], preferred_element_type=jnp.float32)
         + b0[...])
    x = jnp.maximum(x, 0.0)

    # Remaining layers (static Python loop; biases loaded once per step).
    for i in range(num_layers - 1):
        wv = layer_refs[2 * i][...]
        bv = layer_refs[2 * i + 1][...]
        x = jnp.dot(x.astype(wv.dtype), wv,
                    preferred_element_type=jnp.float32) + bv
        x = jnp.maximum(x, 0.0)

    # --- NeuMF head: VPU multiply + lane reduce (no concat, no N=1 matmul)
    gmf_dot = jnp.sum(og * w_gmf[...], axis=-1)     # (TB,)
    mlp_dot = jnp.sum(x * w_mlp[...], axis=-1)      # (TB,)
    pred = (gmf_dot + mlp_dot)[None, :] + b_pred[...]   # (1, TB) lane-dense
    out_ref[...] = pred.astype(out_ref.dtype)


def ncf_forward(params, user, item, *, num_layers, tb=None,
                compute_dtype=jnp.float32):
    """NeuMF-end forward pass. Returns a (B,) f32 vector of predictions."""
    f = params["embed_user_GMF"].shape[1]          # factor_num
    d = params["embed_user_MLP"].shape[1]          # factor_num * 2^(L-1)
    batch = user.shape[0]

    # ---- embedding gathers (wrapper glue) --------------------------------
    eu_gmf = jnp.take(params["embed_user_GMF"], user, axis=0)
    ei_gmf = jnp.take(params["embed_item_GMF"], item, axis=0)
    eu_mlp = jnp.take(params["embed_user_MLP"], user, axis=0)
    ei_mlp = jnp.take(params["embed_item_MLP"], item, axis=0)

    # ---- batch tile + padding --------------------------------------------
    if tb is None:
        tb = 256 if batch > 256 else _round_up(batch, 8)
    if batch > tb:                       # multi-tile: lane-dense out => %128
        tb = _round_up(tb, 128)
    b_pad = _round_up(batch, tb)
    if b_pad != batch:
        pad = ((0, b_pad - batch), (0, 0))
        eu_gmf = jnp.pad(eu_gmf, pad)
        ei_gmf = jnp.pad(ei_gmf, pad)
        eu_mlp = jnp.pad(eu_mlp, pad)
        ei_mlp = jnp.pad(ei_mlp, pad)

    # ---- weight prep: split W0 and pred_w (eliminates both concats) ------
    w0 = params["mlp_w"][0]                        # (2d, d)
    w0u, w0i = w0[:d, :], w0[d:, :]
    wp = params["pred_w"]                          # (2f, 1)
    w_gmf = wp[:f, :].T                            # (1, f)
    w_mlp = wp[f:, :].T                            # (1, f)

    cast = lambda a: a.astype(compute_dtype)
    emb = [cast(eu_gmf), cast(ei_gmf), cast(eu_mlp), cast(ei_mlp)]
    weights = [cast(w0u), cast(w0i), params["mlp_b"][0].astype(jnp.float32)]
    for i in range(1, num_layers):
        weights.append(cast(params["mlp_w"][i]))
        weights.append(params["mlp_b"][i].astype(jnp.float32))
    weights += [w_gmf.astype(jnp.float32), w_mlp.astype(jnp.float32),
                params["pred_b"].astype(jnp.float32)]

    emb_spec_f = pl.BlockSpec((tb, f), lambda i: (i, 0))
    emb_spec_d = pl.BlockSpec((tb, d), lambda i: (i, 0))
    in_specs = [emb_spec_f, emb_spec_f, emb_spec_d, emb_spec_d]
    in_specs += [_resident_spec(w) for w in weights]

    out = pl.pallas_call(
        functools.partial(_ncf_kernel, num_layers),
        grid=(b_pad // tb,),
        in_specs=in_specs,
        out_specs=pl.BlockSpec((1, tb), lambda i: (0, i)),
        out_shape=jax.ShapeDtypeStruct((1, b_pad), jnp.float32),
        compiler_params=pltpu.CompilerParams(
            dimension_semantics=("parallel",)),
    )(*emb, *weights)
    return out.reshape(-1)[:batch]


def ncf_reference(params, user, item, *, num_layers):
    """Pure-JAX reference (mirrors the PyTorch NeuMF-end forward)."""
    hp = jax.lax.Precision.HIGHEST
    eu_gmf = params["embed_user_GMF"][user]
    ei_gmf = params["embed_item_GMF"][item]
    eu_mlp = params["embed_user_MLP"][user]
    ei_mlp = params["embed_item_MLP"][item]
    x = jnp.concatenate([eu_mlp, ei_mlp], axis=-1)
    for i in range(num_layers):
        x = jnp.maximum(
            jnp.dot(x, params["mlp_w"][i], precision=hp) + params["mlp_b"][i],
            0.0)
    feat = jnp.concatenate([eu_gmf * ei_gmf, x], axis=-1)
    return (jnp.dot(feat, params["pred_w"], precision=hp)
            + params["pred_b"]).reshape(-1)


def init_params(key, user_num, item_num, factor_num, num_layers):
    """Deterministic parameter init mirroring NCF._init_weight_ (shapes only)."""
    keys = jax.random.split(key, 6 + 2 * num_layers)
    mlp_embed_dim = factor_num * 2 ** (num_layers - 1)

    params = {
        "embed_user_GMF": 0.01 * jax.random.normal(
            keys[0], (user_num, factor_num), jnp.float32),
        "embed_item_GMF": 0.01 * jax.random.normal(
            keys[1], (item_num, factor_num), jnp.float32),
        "embed_user_MLP": 0.01 * jax.random.normal(
            keys[2], (user_num, mlp_embed_dim), jnp.float32),
        "embed_item_MLP": 0.01 * jax.random.normal(
            keys[3], (item_num, mlp_embed_dim), jnp.float32),
        "mlp_w": [],
        "mlp_b": [],
    }

    for i in range(num_layers):
        in_size = factor_num * 2 ** (num_layers - i)
        out_size = in_size // 2
        limit = (6.0 / (in_size + out_size)) ** 0.5
        w = jax.random.uniform(keys[4 + i], (in_size, out_size), jnp.float32,
                               minval=-limit, maxval=limit)
        params["mlp_w"].append(w)
        params["mlp_b"].append(jnp.zeros((1, out_size), jnp.float32))

    predict_size = factor_num * 2  # NeuMF-end
    limit = (6.0 / (predict_size + 1)) ** 0.5
    params["pred_w"] = jax.random.uniform(
        keys[4 + num_layers], (predict_size, 1), jnp.float32,
        minval=-limit, maxval=limit)
    params["pred_b"] = jnp.zeros((1, 1), jnp.float32)
    return params


if __name__ == "__main__":
    user_num = 24
    item_num = 40
    factor_num = 16
    num_layers = 3

    key = jax.random.PRNGKey(0)
    k_param, k_data = jax.random.split(key)
    params = init_params(k_param, user_num, item_num, factor_num, num_layers)

    # (batch, compute dtype): single-tile f32, multi-tile f32, multi-tile bf16.
    cases = [(8, jnp.float32), (300, jnp.float32), (300, jnp.bfloat16)]
    for batch, dtype in cases:
        ku, ki = jax.random.split(jax.random.fold_in(k_data, batch))
        user = jax.random.randint(ku, (batch,), 0, user_num, dtype=jnp.int32)
        item = jax.random.randint(ki, (batch,), 0, item_num, dtype=jnp.int32)

        pred = ncf_forward(params, user, item, num_layers=num_layers,
                           compute_dtype=dtype)
        jax.block_until_ready(pred)
        assert pred.shape == (batch,), pred.shape
        assert pred.dtype == jnp.float32, pred.dtype

        ref = ncf_reference(params, user, item, num_layers=num_layers)
        atol = 1e-3 if dtype == jnp.float32 else 5e-3
        max_err = float(jnp.max(jnp.abs(pred - ref)))
        assert jnp.allclose(pred, ref, atol=atol, rtol=1e-1), (batch, dtype, max_err)

    print("KERNEL_OK")
</pallas_src>

<mosaic_0001>
module attributes {stable_mosaic.version = 11 : i64} {
  func.func @_ncf_kernel(%arg0: i32, %arg1: memref<8x16xf32, #tpu.memory_space<vmem>>, %arg2: memref<8x16xf32, #tpu.memory_space<vmem>>, %arg3: memref<8x64xf32, #tpu.memory_space<vmem>>, %arg4: memref<8x64xf32, #tpu.memory_space<vmem>>, %arg5: memref<64x64xf32, #tpu.memory_space<vmem>>, %arg6: memref<64x64xf32, #tpu.memory_space<vmem>>, %arg7: memref<1x64xf32, #tpu.memory_space<vmem>>, %arg8: memref<64x32xf32, #tpu.memory_space<vmem>>, %arg9: memref<1x32xf32, #tpu.memory_space<vmem>>, %arg10: memref<32x16xf32, #tpu.memory_space<vmem>>, %arg11: memref<1x16xf32, #tpu.memory_space<vmem>>, %arg12: memref<1x16xf32, #tpu.memory_space<vmem>>, %arg13: memref<1x16xf32, #tpu.memory_space<vmem>>, %arg14: memref<1x1xf32, #tpu.memory_space<vmem>>, %arg15: memref<1x8xf32, #tpu.memory_space<vmem>>) attributes {dimension_semantics = [#tpu.dimension_semantics<parallel>], iteration_bounds = array<i64: 1>, scalar_prefetch = 0 : i64, scratch_operands = 0 : i64, tpu.core_type = #tpu.core_type<tc>, window_params = [{transform_indices = @transform_0, window_bounds = array<i64: 8, 16>}, {transform_indices = @transform_1, window_bounds = array<i64: 8, 16>}, {transform_indices = @transform_2, window_bounds = array<i64: 8, 64>}, {transform_indices = @transform_3, window_bounds = array<i64: 8, 64>}, {pipeline_mode = #tpu.pipeline_mode<synchronous>, transform_indices = @transform_4, window_bounds = array<i64: 64, 64>}, {pipeline_mode = #tpu.pipeline_mode<synchronous>, transform_indices = @transform_5, window_bounds = array<i64: 64, 64>}, {pipeline_mode = #tpu.pipeline_mode<synchronous>, transform_indices = @transform_6, window_bounds = array<i64: 1, 64>}, {pipeline_mode = #tpu.pipeline_mode<synchronous>, transform_indices = @transform_7, window_bounds = array<i64: 64, 32>}, {pipeline_mode = #tpu.pipeline_mode<synchronous>, transform_indices = @transform_8, window_bounds = array<i64: 1, 32>}, {pipeline_mode = #tpu.pipeline_mode<synchronous>, transform_indices = @transform_9, window_bounds = array<i64: 32, 16>}, {pipeline_mode = #tpu.pipeline_mode<synchronous>, transform_indices = @transform_10, window_bounds = array<i64: 1, 16>}, {pipeline_mode = #tpu.pipeline_mode<synchronous>, transform_indices = @transform_11, window_bounds = array<i64: 1, 16>}, {pipeline_mode = #tpu.pipeline_mode<synchronous>, transform_indices = @transform_12, window_bounds = array<i64: 1, 16>}, {pipeline_mode = #tpu.pipeline_mode<synchronous>, transform_indices = @transform_13, window_bounds = array<i64: 1, 1>}, {transform_indices = @transform_14, window_bounds = array<i64: 1, 8>}]} {
    %c0 = arith.constant 0 : index
    %c0_0 = arith.constant 0 : index
    %0 = vector.load %arg1[%c0, %c0_0] : memref<8x16xf32, #tpu.memory_space<vmem>>, vector<8x16xf32>
    %c0_1 = arith.constant 0 : index
    %c0_2 = arith.constant 0 : index
    %1 = vector.load %arg2[%c0_1, %c0_2] : memref<8x16xf32, #tpu.memory_space<vmem>>, vector<8x16xf32>
    %2 = arith.mulf %0, %1 : vector<8x16xf32>
    %c0_3 = arith.constant 0 : index
    %c0_4 = arith.constant 0 : index
    %3 = vector.load %arg3[%c0_3, %c0_4] : memref<8x64xf32, #tpu.memory_space<vmem>>, vector<8x64xf32>
    %c0_5 = arith.constant 0 : index
    %c0_6 = arith.constant 0 : index
    %4 = vector.load %arg5[%c0_5, %c0_6] : memref<64x64xf32, #tpu.memory_space<vmem>>, vector<64x64xf32>
    %cst = arith.constant dense<0.000000e+00> : vector<8x64xf32>
    %5 = tpu.matmul %3, %4, %cst {dimension_numbers = #tpu.dot_dimension_numbers<[1], [0], [0], [1], [0, 0, 1, 1], [], []>} : vector<8x64xf32>, vector<64x64xf32>, vector<8x64xf32> -> vector<8x64xf32>
    %c0_7 = arith.constant 0 : index
    %c0_8 = arith.constant 0 : index
    %6 = vector.load %arg4[%c0_7, %c0_8] : memref<8x64xf32, #tpu.memory_space<vmem>>, vector<8x64xf32>
    %c0_9 = arith.constant 0 : index
    %c0_10 = arith.constant 0 : index
    %7 = vector.load %arg6[%c0_9, %c0_10] : memref<64x64xf32, #tpu.memory_space<vmem>>, vector<64x64xf32>
    %cst_11 = arith.constant dense<0.000000e+00> : vector<8x64xf32>
    %8 = tpu.matmul %6, %7, %cst_11 {dimension_numbers = #tpu.dot_dimension_numbers<[1], [0], [0], [1], [0, 0, 1, 1], [], []>} : vector<8x64xf32>, vector<64x64xf32>, vector<8x64xf32> -> vector<8x64xf32>
    %9 = arith.addf %5, %8 : vector<8x64xf32>
    %c0_12 = arith.constant 0 : index
    %c0_13 = arith.constant 0 : index
    %10 = vector.load %arg7[%c0_12, %c0_13] : memref<1x64xf32, #tpu.memory_space<vmem>>, vector<1x64xf32>
    %11 = vector.broadcast %10 : vector<1x64xf32> to vector<8x64xf32>
    %12 = arith.addf %9, %11 : vector<8x64xf32>
    %cst_14 = arith.constant 0.000000e+00 : f32
    %13 = vector.broadcast %cst_14 : f32 to vector<8x64xf32>
    %14 = arith.maximumf %12, %13 : vector<8x64xf32>
    %c0_15 = arith.constant 0 : index
    %c0_16 = arith.constant 0 : index
    %15 = vector.load %arg8[%c0_15, %c0_16] : memref<64x32xf32, #tpu.memory_space<vmem>>, vector<64x32xf32>
    %c0_17 = arith.constant 0 : index
    %c0_18 = arith.constant 0 : index
    %16 = vector.load %arg9[%c0_17, %c0_18] : memref<1x32xf32, #tpu.memory_space<vmem>>, vector<1x32xf32>
    %cst_19 = arith.constant dense<0.000000e+00> : vector<8x32xf32>
    %17 = tpu.matmul %14, %15, %cst_19 {dimension_numbers = #tpu.dot_dimension_numbers<[1], [0], [0], [1], [0, 0, 1, 1], [], []>} : vector<8x64xf32>, vector<64x32xf32>, vector<8x32xf32> -> vector<8x32xf32>
    %18 = vector.broadcast %16 : vector<1x32xf32> to vector<8x32xf32>
    %19 = arith.addf %17, %18 : vector<8x32xf32>
    %cst_20 = arith.constant 0.000000e+00 : f32
    %20 = vector.broadcast %cst_20 : f32 to vector<8x32xf32>
    %21 = arith.maximumf %19, %20 : vector<8x32xf32>
    %c0_21 = arith.constant 0 : index
    %c0_22 = arith.constant 0 : index
    %22 = vector.load %arg10[%c0_21, %c0_22] : memref<32x16xf32, #tpu.memory_space<vmem>>, vector<32x16xf32>
    %c0_23 = arith.constant 0 : index
    %c0_24 = arith.constant 0 : index
    %23 = vector.load %arg11[%c0_23, %c0_24] : memref<1x16xf32, #tpu.memory_space<vmem>>, vector<1x16xf32>
    %cst_25 = arith.constant dense<0.000000e+00> : vector<8x16xf32>
    %24 = tpu.matmul %21, %22, %cst_25 {dimension_numbers = #tpu.dot_dimension_numbers<[1], [0], [0], [1], [0, 0, 1, 1], [], []>} : vector<8x32xf32>, vector<32x16xf32>, vector<8x16xf32> -> vector<8x16xf32>
    %25 = vector.broadcast %23 : vector<1x16xf32> to vector<8x16xf32>
    %26 = arith.addf %24, %25 : vector<8x16xf32>
    %cst_26 = arith.constant 0.000000e+00 : f32
    %27 = vector.broadcast %cst_26 : f32 to vector<8x16xf32>
    %28 = arith.maximumf %26, %27 : vector<8x16xf32>
    %c0_27 = arith.constant 0 : index
    %c0_28 = arith.constant 0 : index
    %29 = vector.load %arg12[%c0_27, %c0_28] : memref<1x16xf32, #tpu.memory_space<vmem>>, vector<1x16xf32>
    %30 = vector.broadcast %29 : vector<1x16xf32> to vector<8x16xf32>
    %31 = arith.mulf %2, %30 : vector<8x16xf32>
    %cst_29 = arith.constant dense<0.000000e+00> : vector<8xf32>
    %32 = vector.multi_reduction <add>, %31, %cst_29 [1] : vector<8x16xf32> to vector<8xf32>
    %c0_30 = arith.constant 0 : index
    %c0_31 = arith.constant 0 : index
    %33 = vector.load %arg13[%c0_30, %c0_31] : memref<1x16xf32, #tpu.memory_space<vmem>>, vector<1x16xf32>
    %34 = vector.broadcast %33 : vector<1x16xf32> to vector<8x16xf32>
    %35 = arith.mulf %28, %34 : vector<8x16xf32>
    %cst_32 = arith.constant dense<0.000000e+00> : vector<8xf32>
    %36 = vector.multi_reduction <add>, %35, %cst_32 [1] : vector<8x16xf32> to vector<8xf32>
    %37 = arith.addf %32, %36 : vector<8xf32>
    %38 = vector.shape_cast %37 : vector<8xf32> to vector<1x8xf32>
    %c0_33 = arith.constant 0 : index
    %c0_34 = arith.constant 0 : index
    %39 = vector.load %arg14[%c0_33, %c0_34] : memref<1x1xf32, #tpu.memory_space<vmem>>, vector<1x1xf32>
    %40 = vector.broadcast %39 : vector<1x1xf32> to vector<1x8xf32>
    %41 = arith.addf %38, %40 : vector<1x8xf32>
    %c0_35 = arith.constant 0 : index
    %c0_36 = arith.constant 0 : index
    %42 = vector.load %arg15[%c0_35, %c0_36] : memref<1x8xf32, #tpu.memory_space<vmem>>, vector<1x8xf32>
    tpu.vector_store %arg15[%c0_35, %c0_36], %41 {strides = array<i32>} : memref<1x8xf32, #tpu.memory_space<vmem>>, vector<1x8xf32>,
    return
  }
  func.func @transform_0(%arg0: i32) -> (i32, i32) {
    %c0_i32 = arith.constant 0 : i32
    %c0_i32_0 = arith.constant 0 : i32
    return %arg0, %c0_i32 : i32, i32
  }
  func.func @transform_1(%arg0: i32) -> (i32, i32) {
    %c0_i32 = arith.constant 0 : i32
    %c0_i32_0 = arith.constant 0 : i32
    return %arg0, %c0_i32 : i32, i32
  }
  func.func @transform_2(%arg0: i32) -> (i32, i32) {
    %c0_i32 = arith.constant 0 : i32
    %c0_i32_0 = arith.constant 0 : i32
    return %arg0, %c0_i32 : i32, i32
  }
  func.func @transform_3(%arg0: i32) -> (i32, i32) {
    %c0_i32 = arith.constant 0 : i32
    %c0_i32_0 = arith.constant 0 : i32
    return %arg0, %c0_i32 : i32, i32
  }
  func.func @transform_4(%arg0: i32) -> (i32, i32) {
    %c0_i32 = arith.constant 0 : i32
    %c0_i32_0 = arith.constant 0 : i32
    %c0_i32_1 = arith.constant 0 : i32
    return %c0_i32, %c0_i32_0 : i32, i32
  }
  func.func @transform_5(%arg0: i32) -> (i32, i32) {
    %c0_i32 = arith.constant 0 : i32
    %c0_i32_0 = arith.constant 0 : i32
    %c0_i32_1 = arith.constant 0 : i32
    return %c0_i32, %c0_i32_0 : i32, i32
  }
  func.func @transform_6(%arg0: i32) -> (i32, i32) {
    %c0_i32 = arith.constant 0 : i32
    %c0_i32_0 = arith.constant 0 : i32
    %c0_i32_1 = arith.constant 0 : i32
    return %c0_i32, %c0_i32_0 : i32, i32
  }
  func.func @transform_7(%arg0: i32) -> (i32, i32) {
    %c0_i32 = arith.constant 0 : i32
    %c0_i32_0 = arith.constant 0 : i32
    %c0_i32_1 = arith.constant 0 : i32
    return %c0_i32, %c0_i32_0 : i32, i32
  }
  func.func @transform_8(%arg0: i32) -> (i32, i32) {
    %c0_i32 = arith.constant 0 : i32
    %c0_i32_0 = arith.constant 0 : i32
    %c0_i32_1 = arith.constant 0 : i32
    return %c0_i32, %c0_i32_0 : i32, i32
  }
  func.func @transform_9(%arg0: i32) -> (i32, i32) {
    %c0_i32 = arith.constant 0 : i32
    %c0_i32_0 = arith.constant 0 : i32
    %c0_i32_1 = arith.constant 0 : i32
    return %c0_i32, %c0_i32_0 : i32, i32
  }
  func.func @transform_10(%arg0: i32) -> (i32, i32) {
    %c0_i32 = arith.constant 0 : i32
    %c0_i32_0 = arith.constant 0 : i32
    %c0_i32_1 = arith.constant 0 : i32
    return %c0_i32, %c0_i32_0 : i32, i32
  }
  func.func @transform_11(%arg0: i32) -> (i32, i32) {
    %c0_i32 = arith.constant 0 : i32
    %c0_i32_0 = arith.constant 0 : i32
    %c0_i32_1 = arith.constant 0 : i32
    return %c0_i32, %c0_i32_0 : i32, i32
  }
  func.func @transform_12(%arg0: i32) -> (i32, i32) {
    %c0_i32 = arith.constant 0 : i32
    %c0_i32_0 = arith.constant 0 : i32
    %c0_i32_1 = arith.constant 0 : i32
    return %c0_i32, %c0_i32_0 : i32, i32
  }
  func.func @transform_13(%arg0: i32) -> (i32, i32) {
    %c0_i32 = arith.constant 0 : i32
    %c0_i32_0 = arith.constant 0 : i32
    %c0_i32_1 = arith.constant 0 : i32
    return %c0_i32, %c0_i32_0 : i32, i32
  }
  func.func @transform_14(%arg0: i32) -> (i32, i32) {
    %c0_i32 = arith.constant 0 : i32
    %c0_i32_0 = arith.constant 0 : i32
    return %c0_i32, %arg0 : i32, i32
  }
}

</mosaic_0001>

<bundles_post_ra>
// kernel: tpu_custom_call.1
= control target key start
LH: loop header
LB: loop body
LE: loop exit
PB: predicated region body
PF: predicated region fallthrough
CT: control target
= control target key end

     0   :  { %s907_s0 = inlined_call_operand.vmem [shape: f32[8,16], index: 0, kind: input, shape index: {}]   ;;  %s908_s1 = inlined_call_operand.vmem [shape: f32[8,16], index: 1, kind: input, shape index: {}]   ;;  %s909_s2 = inlined_call_operand.hbm [shape: f32[8,64], index: 2, kind: input, shape index: {}]   ;;  %s910_s3 = inlined_call_operand.hbm [shape: f32[8,64], index: 3, kind: input, shape index: {}]   ;;  %s911_s4 = inlined_call_operand.vmem [shape: f32[64,64], index: 4, kind: input, shape index: {}]   ;;  %s912_s5 = inlined_call_operand.vmem [shape: f32[64,64], index: 5, kind: input, shape index: {}]   ;;  %s913_s6 = inlined_call_operand.vmem [shape: f32[1,64], index: 6, kind: input, shape index: {}]   ;;  %s914_s7 = inlined_call_operand.vmem [shape: f32[64,32], index: 7, kind: input, shape index: {}]   ;;  %s915_s8 = inlined_call_operand.vmem [shape: f32[1,32], index: 8, kind: input, shape index: {}]   ;;  %s916_s9 = inlined_call_operand.vmem [shape: f32[32,16], index: 9, kind: input, shape index: {}]   ;;  %s917_s10 = inlined_call_operand.vmem [shape: f32[1,16], index: 10, kind: input, shape index: {}]   ;;  %s918_s11 = inlined_call_operand.vmem [shape: f32[1,16], index: 11, kind: input, shape index: {}]   ;;  %s919_s12 = inlined_call_operand.vmem [shape: f32[1,16], index: 12, kind: input, shape index: {}]   ;;  %s920_s13 = inlined_call_operand.<no memory space> [shape: f32[1,1], index: 13, kind: input, shape index: {}]   ;;  %s921_s14 = inlined_call_operand.hbm [shape: f32[1,8], index: 14, kind: output, shape index: {}]  }
   0x1   :  { %v19_v0 = vstv %s920_s13 }
   0x2   :  { %20 = vst [vmem:[#allocation2] sm:$0x1] %v19_v0 }
   0x3   :  { %21 = vsyncpa [#allocation4], 0 }
   0x4   :  { %22 = vsyncpa [#allocation7], 0 }
   0x5   :  { %23 = vsyncpa [#allocation5], 0  ;;  %s670_s15 = smov [#allocation3]   ;;  %s671_s17 = smov [#allocation6]  }
   0x6   :  { %s34_s16 = sshll.u32 %s670_s15, 4  ;;  %s44_s18 = sshll.u32 %s671_s17, 4  ;;  %s35_s16 = int_to_ptr.vmem [resolvable:$true] %s34_s16  ;;  %s45_s18 = int_to_ptr.vmem [resolvable:$true] %s44_s18 }
   0x7   :  { %s612_s19 = scalar_lea.vmem %s35_s16, 128  ;;  %p617_p1 = scmp.lt.s32.totalorder %s35_s16, %s35_s16 }
   0x8   :  { %p613_p0 = scmp.ne.s32.totalorder %s35_s16, %s612_s19  ;;  %p618_p2 = scmp.lt.s32.totalorder %s612_s19, %s612_s19 }
   0xa   :  { %p619_p3 = por %p618_p2, %p617_p1 }
   0xc   :  { %p620_p4 = pnand %p619_p3, %p613_p0 }
   0xe   :  { %623 = shalt.err (!%p620_p4)
}
   0xf   :  { %37 = dma.hbm_to_vmem [thread:$0]  %s909_s2, 128, %s35_s16, [#allocation4]  }
  0x10   :  { %s632_s13 = scalar_lea.vmem %s45_s18, 128  ;;  %p637_p6 = scmp.lt.s32.totalorder %s45_s18, %s45_s18 }
  0x11   :  { %p633_p5 = scmp.ne.s32.totalorder %s45_s18, %s632_s13  ;;  %p638_p7 = scmp.lt.s32.totalorder %s632_s13, %s632_s13 }
  0x13   :  { %p639_p8 = por %p638_p7, %p637_p6 }
  0x15   :  { %p640_p9 = pnand %p639_p8, %p633_p5 }
  0x17   :  { %643 = shalt.err (!%p640_p9)
}
  0x18   :  { %47 = dma.hbm_to_vmem [thread:$0]  %s910_s3, 128, %s45_s18, [#allocation7]  }
  0x19   :  { %664 = dma.done.wait [#allocation4], 128  }
  0x1a   :  { %665 = vsyncadd [#allocation4], 4294967168 }
  0x1b   :  { %666 = dma.done.wait [#allocation7], 128  }
  0x1c   :  { %667 = vsyncadd [#allocation7], 4294967168  ;;  %v672_v1 = vmov 0.0   ;;  %vm673_vm0 = vmmov 0   ;;  %v94_v2 = vld [vmem:[%s912_s5 + $0x38] sm:$0xff]  ;;  %v93_v4 = vld [vmem:[%s912_s5 + $0x30] sm:$0xff]  ;;  %v456_v61 = vlaneseq }
  0x1d   :  { %528 = vmatprep.subr.mxu0 %v672_v1  ;;  %547 = vmatprep.subr.mxu1 %v672_v1  ;;  %v85_v3 = vld [vmem:[%s911_s4 + $0x38] sm:$0xff]  ;;  %v84_v5 = vld [vmem:[%s911_s4 + $0x30] sm:$0xff]  ;;  %v92_v6 = vld [vmem:[%s912_s5 + $0x28] sm:$0xff]  ;;  %vm95_vm1 = vcmask 523264   ;;  %vm351_vm2 = vcmask 261120   ;;  %vm434_vm3 = vcmask 130048  }
  0x1e   :  { %544 = vmatprep.mubr.msk.f32.mxu0 %vm673_vm0, %v672_v1  ;;  %563 = vmatprep.mubr.msk.f32.mxu1 %vm673_vm0, %v672_v1  ;;  %v83_v7 = vld [vmem:[%s911_s4 + $0x28] sm:$0xff]  ;;  %v91_v8 = vld [vmem:[%s912_s5 + $0x20] sm:$0xff]  ;;  %v90_v10 = vld [vmem:[%s912_s5 + $0x18] sm:$0xff]  ;;  %v674_v52 = vmov 0   ;;  %v457_v62 = vshrl.u32 %v456_v61, 7  ;;  %vm469_vm4 = vcmask 57344  }
  0x1f   :  { %529 = vmatpush3.msra.mxu0 %v94_v2  ;;  %548 = vmatpush3.msra.mxu1 %v85_v3  ;;  %v82_v9 = vld [vmem:[%s911_s4 + $0x20] sm:$0xff]  ;;  %v81_v11 = vld [vmem:[%s911_s4 + $0x18] sm:$0xff]  ;;  %v89_v12 = vld [vmem:[%s912_s5 + $0x10] sm:$0xff]  ;;  %v463_v2 = vand.u32 127, %v456_v61 }
  0x20   :  { %530 = vmatprep.subr.mxu0 %v672_v1  ;;  %549 = vmatprep.subr.mxu1 %v672_v1  ;;  %v80_v13 = vld [vmem:[%s911_s4 + $0x10] sm:$0xff]  ;;  %v88_v14 = vld [vmem:[%s912_s5 + $0x8] sm:$0xff]  ;;  %v87_v16 = vld [vmem:[%s912_s5] sm:$0xff]  ;;  %v458_v0 = vsub.s32 0, %v457_v62 }
  0x21   :  { %531 = vmatpush3.msra.mxu0 %v93_v4  ;;  %550 = vmatpush3.msra.mxu1 %v84_v5  ;;  %v79_v15 = vld [vmem:[%s911_s4 + $0x8] sm:$0xff]  ;;  %v78_v17 = vld [vmem:[%s911_s4] sm:$0xff]  ;;  %v258_v20 = vld [vmem:[%s914_s7 + $0x38] sm:$0xff]  ;;  %v466_v5 = vsub.s32 %v463_v2, %v457_v62 }
  0x22   :  { %532 = vmatprep.subr.mxu0 %v672_v1  ;;  %551 = vmatprep.subr.mxu1 %v672_v1  ;;  %v86_v18 = vld [vmem:[#allocation6] sm:$0xff]  ;;  %v77_v19 = vld [vmem:[#allocation3] sm:$0xff]  ;;  %v254_v24 = vld [vmem:[%s914_s7 + $0x18] sm:$0xff] }
  0x23   :  { %533 = vmatpush3.msra.mxu0 %v92_v6  ;;  %552 = vmatpush3.msra.mxu1 %v83_v7  ;;  %v257_v21 = vld [vmem:[%s914_s7 + $0x30] sm:$0xff]  ;;  %v256_v22 = vld [vmem:[%s914_s7 + $0x28] sm:$0xff]  ;;  %v255_v23 = vld [vmem:[%s914_s7 + $0x20] sm:$0xff] }
  0x24   :  { %534 = vmatprep.subr.mxu0 %v672_v1  ;;  %553 = vmatprep.subr.mxu1 %v672_v1  ;;  %v253_v25 = vld [vmem:[%s914_s7 + $0x10] sm:$0xff]  ;;  %v252_v26 = vld [vmem:[%s914_s7 + $0x8] sm:$0xff]  ;;  %v251_v27 = vld [vmem:[%s914_s7] sm:$0xff] }
  0x25   :  { %535 = vmatpush3.msra.mxu0 %v91_v8  ;;  %554 = vmatpush3.msra.mxu1 %v82_v9  ;;  %v343_v28 = vld [vmem:[%s916_s9 + $0x18] sm:$0xff]  ;;  %v489_v31 = vld [vmem:[%s913_s6] ss:$0 sm:$0xff]  ;;  %v342_v37 = vld [vmem:[%s916_s9 + $0x10] sm:$0xff] }
  0x26   :  { %536 = vmatprep.subr.mxu0 %v672_v1  ;;  %555 = vmatprep.subr.mxu1 %v672_v1  ;;  %v341_v38 = vld [vmem:[%s916_s9 + $0x8] sm:$0xff]  ;;  %v340_v39 = vld [vmem:[%s916_s9] sm:$0xff] }
  0x27   :  { %537 = vmatpush3.msra.mxu0 %v90_v10  ;;  %556 = vmatpush3.msra.mxu1 %v81_v11  ;;  %v490_v40 = vld [vmem:[%s915_s8] ss:$0 sm:$0xff] }
  0x28   :  { %538 = vmatprep.subr.mxu0 %v672_v1  ;;  %557 = vmatprep.subr.mxu1 %v672_v1  ;;  %v74_v45 = vld [vmem:[%s907_s0] sm:$0xff] }
  0x29   :  { %539 = vmatpush3.msra.mxu0 %v89_v12  ;;  %558 = vmatpush3.msra.mxu1 %v80_v13  ;;  %v75_v46 = vld [vmem:[%s908_s1] sm:$0xff] }
  0x2a   :  { %540 = vmatprep.subr.mxu0 %v672_v1  ;;  %559 = vmatprep.subr.mxu1 %v672_v1  ;;  %v76_v47 = vmul.f32 %v75_v46, %v74_v45  ;;  %v494_v48 = vld [vmem:[%s918_s11] ss:$0 sm:$0xff] }
  0x2b   :  { %541 = vmatpush3.msra.mxu0 %v88_v14  ;;  %560 = vmatpush3.msra.mxu1 %v79_v15  ;;  %v450_v51 = vld [vmem:[#allocation2] sm:$0x1] }
  0x2c   :  { %542 = vmatprep.subr.mxu0 %v672_v1  ;;  %561 = vmatprep.subr.mxu1 %v672_v1  ;;  %v433_v49 = vmul.f32 %v494_v48, %v76_v47  ;;  %v492_v53 = vld [vmem:[%s917_s10] ss:$0 sm:$0xff]  ;;  %s675_s10 = smov [#allocation8]  }
  0x2d   :  { %543 = vmatpush3.msra.mxu0 %v87_v16  ;;  %562 = vmatpush3.msra.mxu1 %v78_v17  ;;  %v495_v57 = vld [vmem:[%s919_s12] ss:$0 sm:$0xff]  ;;  %s477_s11 = sshll.u32 %s675_s10, 4  ;;  %s478_s11 = int_to_ptr.vmem [resolvable:$true] %s477_s11 }
  0x2e   :  { %545 = vmatmul.mubr.msk.f32.vlgmr.msra.gmra.mxu0 %vm95_vm1, %v86_v18  ;;  %564 = vmatmul.mubr.msk.f32.vlgmr.msra.gmra.mxu1 %vm95_vm1, %v77_v19  ;;  %v435_v50 = vsel %vm434_vm3, %v433_v49, 0.0  ;;  %s644_s12 = scalar_lea.vmem %s478_s11, 16  ;;  %s648_s25 = scalar_lea.vmem %s478_s11, 32 }
  0x2f   :  { %566 = vmatprep.subr.mxu0 %v672_v1  ;;  %582 = vmatprep.mubr.msk.f32.mxu0 %vm673_vm0, %v672_v1  ;;  %p645_p10 = scmp.ne.s32.totalorder %s478_s11, %s644_s12  ;;  %p649_p11 = scmp.lt.s32.totalorder %s478_s11, %s478_s11 }
  0x30   :  { %567 = vmatpush3.msra.mxu0 %v258_v20  ;;  %585 = vmatprep.subr.mxu1 %v672_v1  ;;  %p650_p12 = scmp.lt.s32.totalorder %s648_s25, %s644_s12 }
  0x31   :  { %568 = vmatprep.subr.mxu0 %v672_v1  ;;  %593 = vmatprep.mubr.msk.f32.mxu1 %vm673_vm0, %v672_v1 }
  0x32   :  { %569 = vmatpush3.msra.mxu0 %v257_v21  ;;  %586 = vmatpush3.msra.mxu1 %v343_v28  ;;  %p651_p13 = por %p650_p12, %p649_p11 }
  0x33   :  { %570 = vmatprep.subr.mxu0 %v672_v1  ;;  %587 = vmatprep.subr.mxu1 %v672_v1 }
  0x34   :  { %571 = vmatpush3.msra.mxu0 %v256_v22  ;;  %588 = vmatpush3.msra.mxu1 %v342_v37  ;;  %p652_p0 = pnand %p651_p13, %p645_p10 }
  0x35   :  { %572 = vmatprep.subr.mxu0 %v672_v1  ;;  %589 = vmatprep.subr.mxu1 %v672_v1 }
  0x36   :  { %573 = vmatpush3.msra.mxu0 %v255_v23  ;;  %590 = vmatpush3.msra.mxu1 %v341_v38 }
  0x37   :  { %574 = vmatprep.subr.mxu0 %v672_v1  ;;  %591 = vmatprep.subr.mxu1 %v672_v1 }
  0x38   :  { %575 = vmatpush3.msra.mxu0 %v254_v24  ;;  %592 = vmatpush3.msra.mxu1 %v340_v39 }
  0x39   :  { %576 = vmatprep.subr.mxu0 %v672_v1  ;;  %436 = vadd.xlane.f32.xlu0 %v435_v50 }
  0x3a   :  { %577 = vmatpush3.msra.mxu0 %v253_v25  ;;  %602 = vset.pattern.permute.xlu1 %v674_v52 }
  0x3b   :  { %578 = vmatprep.subr.mxu0 %v672_v1  ;;  %603 = vset.pattern.permute.xlu0 %v674_v52 }
  0x3c   :  { %579 = vmatpush3.msra.mxu0 %v252_v26  ;;  %453 = vperm.xlu1 %602, %v450_v51  }
  0x3d   :  { %580 = vmatprep.subr.mxu0 %v672_v1 }
  0x3e   :  { %581 = vmatpush3.msra.mxu0 %v251_v27 }
  0xb7   :  { %v454_v1 = vpop.permute.xlu1 %453 }
  0xb8   :  { %v459_v3 = vrot.slane %v454_v1, %v458_v0 }
  0xc2   :  { %v437_v63 = vpop.xlane.xlu0 %436 }
  0xee   :  { %v165_v29 = vpop.f32.mrf.mxu0  ;;  %v238_v30 = vpop.f32.mrf.mxu1 }
  0xef   :  { %v239_v32 = vadd.f32 %v238_v30, %v165_v29 }
  0xf0   :  { %v546_v33 = vpop.f32.mrf.mxu0  ;;  %v565_v34 = vpop.f32.mrf.mxu1 }
  0xf1   :  { %v249_v35 = vadd.f32 %v489_v31, %v239_v32 }
  0xf3   :  { %v250_v36 = vmax.f32 %v249_v35, 0.0 }
  0xf5   :  { %583 = vmatmul.mubr.msk.f32.vlgmr.msra.gmra.mxu0 %vm95_vm1, %v250_v36 }
 0x1b5   :  { %v335_v41 = vpop.f32.mrf.mxu0 }
 0x1b6   :  { %v336_v42 = vadd.f32 %v490_v40, %v335_v41 }
 0x1b7   :  { %v584_v43 = vpop.f32.mrf.mxu0 }
 0x1b8   :  { %v339_v44 = vmax.f32 %v336_v42, 0.0 }
 0x1ba   :  { %594 = vmatmul.mubr.msk.f32.vlgmr.msra.gmra.mxu1 %vm351_vm2, %v339_v44 }
 0x27a   :  { %v421_v54 = vpop.f32.mrf.mxu1 }
 0x27b   :  { %v422_v55 = vadd.f32 %v492_v53, %v421_v54 }
 0x27c   :  { %v595_v56 = vpop.f32.mrf.mxu1 }
 0x27d   :  { %v425_v58 = vmax.f32 %v422_v55, 0.0 }
 0x27f   :  { %v445_v59 = vmul.f32 %v495_v57, %v425_v58 }
 0x281   :  { %v446_v60 = vsel %vm434_vm3, %v445_v59, 0.0 }
 0x282   :  { %447 = vadd.xlane.f32.xlu0 %v446_v60 }
 0x30b   :  { %v448_v4 = vpop.xlane.xlu0 %447 }
 0x30c   :  { %v449_v6 = vadd.f32 %v448_v4, %v437_v63 }
 0x30e   :  { %v460_v7 = vadd.f32 %v459_v3, %v449_v6 }
 0x310   :  { %v467_v8 = vrot.slane %v460_v7, %v466_v5 }
 0x312   :  { %470 = vst.msk [vmem:[#allocation8] sm:$0x1] %vm469_vm4, %v467_v8 }
 0x313   :  { %655 = shalt.err (!%p652_p0)
}
 0x314   :  { %480 = dma.vmem_to_hbm [thread:$0]  %s478_s11, 16, %s921_s14, [#allocation5]  }
 0x315   :  { %668 = dma.done.wait [#allocation5], 16  }
 0x316   :  { %669 = vsyncadd [#allocation5], 4294967280 }
 0x317   :  { %484 = vsyncpa [#allocation4], 1 }
 0x318   :  { %485 = vsyncpa [#allocation7], 1 }
 0x319   :  { %486 = vsyncpa [#allocation5], 1 }

</bundles_post_ra>
